<compile_context>
chip_gen: v7x
topology: tpu7x:2x2x1
jax: 0.10.0
libtpu: 0.0.40
codegen_flags: <defaults>
</compile_context>

<pallas_src>
import functools

import jax
import jax.numpy as jnp
from jax.experimental import pallas as pl
from jax.experimental.pallas import tpu as pltpu

LANE = 128
SUBLANE = 8


def make_divisible(value, divisor=8, min_value=None, min_ratio=0.9):
    """mmcv.cnn.utils.make_divisible (needed to size the squeeze channels)."""
    if min_value is None:
        min_value = divisor
    new_value = max(min_value, int(value + divisor / 2) // divisor * divisor)
    if new_value < min_ratio * value:
        new_value += divisor
    return new_value


def _round_up(x, m):
    return (x + m - 1) // m * m


# ---------------------------------------------------------------------------
# Pass 1: per-(n, c) spatial mean.  x2 block: (row_tile, hw_tile); output block
# (row_tile, 1) stays resident across the "arbitrary" HW axis and is used as the
# f32 accumulator (init at t == 0, finalize at last t).  Zero padding of the
# lane axis does not perturb the sum; we divide by the *true* H*W.
# ---------------------------------------------------------------------------
def _pool_kernel(x_ref, p_ref, *, inv_hw):
    t = pl.program_id(1)

    @pl.when(t == 0)
    def _init():
        p_ref[...] = jnp.zeros_like(p_ref)

    # f32 accumulation without materializing an upcast copy of the whole tile.
    p_ref[...] += jnp.sum(x_ref[...], axis=1, keepdims=True, dtype=jnp.float32)

    @pl.when(t == pl.num_programs(1) - 1)
    def _finalize():
        p_ref[...] = p_ref[...] * inv_hw


# ---------------------------------------------------------------------------
# Pass 2: excitation MLP, batched over N in a single grid step.
#   pooled (N, C) @ w1t (C, mid) + b1 -> ReLU -> @ w2t (mid, C) + b2 -> HSigmoid
# ---------------------------------------------------------------------------
def _excite_kernel(p_ref, w1t_ref, b1_ref, w2t_ref, b2_ref, s_ref):
    h = jnp.dot(p_ref[...], w1t_ref[...],
                preferred_element_type=jnp.float32) + b1_ref[...]
    h = jnp.maximum(h, 0.0)
    y = jnp.dot(h, w2t_ref[...],
                preferred_element_type=jnp.float32) + b2_ref[...]
    s_ref[...] = jnp.clip((y + 3.0) / 6.0, 0.0, 1.0)        # HSigmoid(bias=3, div=6)


# ---------------------------------------------------------------------------
# Pass 3: out = x * scale, broadcast of a (row, 1) scale over lane-dense
# (row, hw) blocks, done in the input dtype (no f32 upcast of the tile).
# ---------------------------------------------------------------------------
def _scale_mul_kernel(x_ref, s_ref, o_ref):
    o_ref[...] = x_ref[...] * s_ref[...].astype(o_ref.dtype)


def _pick_tiles(nc, hw, itemsize, target_block_bytes, max_lanes):
    """Pick (row_tile, hw_tile, padded_hw) so blocks are ~target_block_bytes,
    the lane dim is a multiple of 128 and both tiles evenly divide the array."""
    hw_padded = _round_up(hw, LANE)
    n128 = hw_padded // LANE
    lane_cap = max(1, max_lanes // LANE)
    d = 1
    for cand in range(min(n128, lane_cap), 0, -1):
        if n128 % cand == 0:
            d = cand
            break
    hw_tile = d * LANE

    target_rows = max(SUBLANE, target_block_bytes // (hw_tile * itemsize))
    if nc <= target_rows:
        row_tile = nc
    else:
        row_tile = nc  # fallback: full extent (always legal)
        for cand in range(int(min(nc, target_rows)), 0, -1):
            if nc % cand == 0 and cand % SUBLANE == 0:
                row_tile = cand
                break
    return row_tile, hw_tile, hw_padded


def se_layer(x, w1, b1, w2, b2, *, target_block_bytes=1 << 20, max_lanes=2048):
    """x: (N, C, H, W). w1: (mid, C), b1: (mid, 1), w2: (C, mid), b2: (C, 1)."""
    N, C, H, W = x.shape
    mid = w1.shape[0]
    HW = H * W
    NC = N * C
    itemsize = jnp.dtype(x.dtype).itemsize

    row_tile, hw_tile, HWp = _pick_tiles(NC, HW, itemsize,
                                         target_block_bytes, max_lanes)
    n_row = NC // row_tile
    n_hw = HWp // hw_tile

    # VMEM budget sized to the actual block footprint (in + out, double-buffered)
    # with generous margin; >= 32 MiB (raises v5e's 16 MiB default), <= 64 MiB
    # (v7x physical VMEM per TensorCore).
    block_bytes = row_tile * hw_tile * itemsize
    vmem_limit = int(min(max(8 * block_bytes, 32 << 20), 64 << 20))

    # Collapse N*C onto the sublane axis; pad HW to a lane-dense multiple of 128.
    x2 = x.reshape(NC, HW)
    if HWp != HW:
        x2 = jnp.pad(x2, ((0, 0), (0, HWp - HW)))

    # ---- Pass 1: pooled (NC, 1) f32 = mean over the true H*W ------------------
    pooled = pl.pallas_call(
        functools.partial(_pool_kernel, inv_hw=1.0 / HW),
        out_shape=jax.ShapeDtypeStruct((NC, 1), jnp.float32),
        grid_spec=pltpu.PrefetchScalarGridSpec(
            num_scalar_prefetch=0,
            grid=(n_row, n_hw),
            in_specs=[pl.BlockSpec((row_tile, hw_tile), lambda i, t: (i, t))],
            out_specs=pl.BlockSpec((row_tile, 1), lambda i, t: (i, 0)),
        ),
        compiler_params=pltpu.CompilerParams(
            dimension_semantics=("parallel", "arbitrary"),
            vmem_limit_bytes=vmem_limit),
    )(x2)

    # ---- Pass 2: excitation MLP, batched over N in one tiny kernel step -------
    scale = pl.pallas_call(
        _excite_kernel,
        out_shape=jax.ShapeDtypeStruct((N, C), jnp.float32),
    )(pooled.reshape(N, C), w1.T, b1.reshape(1, mid), w2.T, b2.reshape(1, C))

    # ---- Pass 3: out = x * scale, fully parallel lane-dense tiles -------------
    out2 = pl.pallas_call(
        _scale_mul_kernel,
        out_shape=jax.ShapeDtypeStruct((NC, HWp), x.dtype),
        grid_spec=pltpu.PrefetchScalarGridSpec(
            num_scalar_prefetch=0,
            grid=(n_row, n_hw),
            in_specs=[pl.BlockSpec((row_tile, hw_tile), lambda i, t: (i, t)),
                      pl.BlockSpec((row_tile, 1), lambda i, t: (i, 0))],
            out_specs=pl.BlockSpec((row_tile, hw_tile), lambda i, t: (i, t)),
        ),
        compiler_params=pltpu.CompilerParams(
            dimension_semantics=("parallel", "parallel"),
            vmem_limit_bytes=vmem_limit),
    )(x2, scale.reshape(NC, 1))

    if HWp != HW:
        out2 = out2[:, :HW]
    return out2.reshape(N, C, H, W)


def se_layer_ref(x, w1, b1, w2, b2):
    """Pure-JAX reference matching the PyTorch forward."""
    pooled = jnp.mean(x, axis=(2, 3))                      # (N, C)
    h = jnp.maximum(pooled @ w1.T + b1[:, 0], 0.0)         # (N, mid)
    y = h @ w2.T + b2[:, 0]                                # (N, C)
    s = jnp.clip((y + 3.0) / 6.0, 0.0, 1.0)
    return x * s[:, :, None, None]


if __name__ == "__main__":
    # Small shapes consistent with the module: channels=32, ratio=16
    # -> mid = make_divisible(32 // 16, 8) = 8.
    N, C, H, W = 2, 32, 16, 16
    ratio = 16
    mid = make_divisible(C // ratio, 8)

    key = jax.random.PRNGKey(0)
    kx, kw1, kb1, kw2, kb2 = jax.random.split(key, 5)

    x = jax.random.normal(kx, (N, C, H, W), dtype=jnp.float32)
    # 1x1 conv weights (kernel spatial dims squeezed away), deterministic init.
    w1 = jax.random.normal(kw1, (mid, C), dtype=jnp.float32) * 0.1
    b1 = jax.random.normal(kb1, (mid, 1), dtype=jnp.float32) * 0.1
    w2 = jax.random.normal(kw2, (C, mid), dtype=jnp.float32) * 0.1
    b2 = jax.random.normal(kb2, (C, 1), dtype=jnp.float32) * 0.1

    se_fn = jax.jit(se_layer)
    out = jax.block_until_ready(se_fn(x, w1, b1, w2, b2))
    ref = se_layer_ref(x, w1, b1, w2, b2)

    assert out.shape == x.shape and out.dtype == x.dtype
    err = float(jnp.max(jnp.abs(out - ref)))
    assert jnp.allclose(out, ref, atol=1e-5, rtol=1e-5), err
    print("KERNEL_OK")
</pallas_src>

<mosaic_0001>
module attributes {stable_mosaic.version = 11 : i64} {
  func.func @_pool_kernel(%arg0: i32, %arg1: i32, %arg2: memref<64x256xf32, #tpu.memory_space<vmem>>, %arg3: memref<64x1xf32, #tpu.memory_space<vmem>>) attributes {dimension_semantics = [#tpu.dimension_semantics<parallel>, #tpu.dimension_semantics<arbitrary>], iteration_bounds = array<i64: 1, 1>, scalar_prefetch = 0 : i64, scratch_operands = 0 : i64, tpu.core_type = #tpu.core_type<tc>, window_params = [{transform_indices = @transform_0, window_bounds = array<i64: 64, 256>}, {transform_indices = @transform_1, window_bounds = array<i64: 64, 1>}]} {
    %c0_i32 = arith.constant 0 : i32
    %0 = arith.cmpi eq, %arg1, %c0_i32 : i32
    %1 = arith.extui %0 : i1 to i32
    %c0_i32_0 = arith.constant 0 : i32
    %2 = arith.cmpi ne, %1, %c0_i32_0 : i32
    scf.if %2 {
      %cst_8 = arith.constant 0.000000e+00 : f32
      %12 = vector.broadcast %cst_8 : f32 to vector<64x1xf32>
      %c0_9 = arith.constant 0 : index
      %c0_10 = arith.constant 0 : index
      %13 = vector.load %arg3[%c0_9, %c0_10] : memref<64x1xf32, #tpu.memory_space<vmem>>, vector<64x1xf32>
      tpu.vector_store %arg3[%c0_9, %c0_10], %12 {strides = array<i32>} : memref<64x1xf32, #tpu.memory_space<vmem>>, vector<64x1xf32>,
    } else {
    }
    %c0 = arith.constant 0 : index
    %c0_1 = arith.constant 0 : index
    %3 = vector.load %arg3[%c0, %c0_1] : memref<64x1xf32, #tpu.memory_space<vmem>>, vector<64x1xf32>
    %c0_2 = arith.constant 0 : index
    %c0_3 = arith.constant 0 : index
    %4 = vector.load %arg2[%c0_2, %c0_3] : memref<64x256xf32, #tpu.memory_space<vmem>>, vector<64x256xf32>
    %cst = arith.constant dense<0.000000e+00> : vector<64xf32>
    %5 = vector.multi_reduction <add>, %4, %cst [1] : vector<64x256xf32> to vector<64xf32>
    %6 = vector.shape_cast %5 : vector<64xf32> to vector<64x1xf32>
    %7 = arith.addf %3, %6 : vector<64x1xf32>
    %c0_4 = arith.constant 0 : index
    %c0_5 = arith.constant 0 : index
    %8 = vector.load %arg3[%c0_4, %c0_5] : memref<64x1xf32, #tpu.memory_space<vmem>>, vector<64x1xf32>
    tpu.vector_store %arg3[%c0_4, %c0_5], %7 {strides = array<i32>} : memref<64x1xf32, #tpu.memory_space<vmem>>, vector<64x1xf32>,
    %c0_i32_6 = arith.constant 0 : i32
    %9 = arith.cmpi eq, %arg1, %c0_i32_6 : i32
    %10 = arith.extui %9 : i1 to i32
    %c0_i32_7 = arith.constant 0 : i32
    %11 = arith.cmpi ne, %10, %c0_i32_7 : i32
    scf.if %11 {
      %c0_8 = arith.constant 0 : index
      %c0_9 = arith.constant 0 : index
      %12 = vector.load %arg3[%c0_8, %c0_9] : memref<64x1xf32, #tpu.memory_space<vmem>>, vector<64x1xf32>
      %cst_10 = arith.constant 3.906250e-03 : f32
      %13 = vector.broadcast %cst_10 : f32 to vector<64x1xf32>
      %14 = arith.mulf %12, %13 : vector<64x1xf32>
      %c0_11 = arith.constant 0 : index
      %c0_12 = arith.constant 0 : index
      %15 = vector.load %arg3[%c0_11, %c0_12] : memref<64x1xf32, #tpu.memory_space<vmem>>, vector<64x1xf32>
      tpu.vector_store %arg3[%c0_11, %c0_12], %14 {strides = array<i32>} : memref<64x1xf32, #tpu.memory_space<vmem>>, vector<64x1xf32>,
    } else {
    }
    return
  }
  func.func @transform_0(%arg0: i32, %arg1: i32) -> (i32, i32) {
    %c0_i32 = arith.constant 0 : i32
    return %arg0, %arg1 : i32, i32
  }
  func.func @transform_1(%arg0: i32, %arg1: i32) -> (i32, i32) {
    %c0_i32 = arith.constant 0 : i32
    %c0_i32_0 = arith.constant 0 : i32
    return %arg0, %c0_i32 : i32, i32
  }
}

module attributes {stable_mosaic.version = 11 : i64} {
  func.func @_excite_kernel(%arg0: memref<2x32xf32, #tpu.memory_space<vmem>>, %arg1: memref<32x8xf32, #tpu.memory_space<vmem>>, %arg2: memref<1x8xf32, #tpu.memory_space<vmem>>, %arg3: memref<8x32xf32, #tpu.memory_space<vmem>>, %arg4: memref<1x32xf32, #tpu.memory_space<vmem>>, %arg5: memref<2x32xf32, #tpu.memory_space<vmem>>) attributes {dimension_semantics = [], scalar_prefetch = 0 : i64, scratch_operands = 0 : i64, tpu.core_type = #tpu.core_type<tc>} {
    %c0 = arith.constant 0 : index
    %c0_0 = arith.constant 0 : index
    %0 = vector.load %arg0[%c0, %c0_0] : memref<2x32xf32, #tpu.memory_space<vmem>>, vector<2x32xf32>
    %c0_1 = arith.constant 0 : index
    %c0_2 = arith.constant 0 : index
    %1 = vector.load %arg1[%c0_1, %c0_2] : memref<32x8xf32, #tpu.memory_space<vmem>>, vector<32x8xf32>
    %cst = arith.constant dense<0.000000e+00> : vector<2x8xf32>
    %2 = tpu.matmul %0, %1, %cst {dimension_numbers = #tpu.dot_dimension_numbers<[1], [0], [0], [1], [0, 0, 1, 1], [], []>} : vector<2x32xf32>, vector<32x8xf32>, vector<2x8xf32> -> vector<2x8xf32>
    %c0_3 = arith.constant 0 : index
    %c0_4 = arith.constant 0 : index
    %3 = vector.load %arg2[%c0_3, %c0_4] : memref<1x8xf32, #tpu.memory_space<vmem>>, vector<1x8xf32>
    %4 = vector.broadcast %3 : vector<1x8xf32> to vector<2x8xf32>
    %5 = arith.addf %2, %4 : vector<2x8xf32>
    %cst_5 = arith.constant 0.000000e+00 : f32
    %6 = vector.broadcast %cst_5 : f32 to vector<2x8xf32>
    %7 = arith.maximumf %5, %6 : vector<2x8xf32>
    %c0_6 = arith.constant 0 : index
    %c0_7 = arith.constant 0 : index
    %8 = vector.load %arg3[%c0_6, %c0_7] : memref<8x32xf32, #tpu.memory_space<vmem>>, vector<8x32xf32>
    %cst_8 = arith.constant dense<0.000000e+00> : vector<2x32xf32>
    %9 = tpu.matmul %7, %8, %cst_8 {dimension_numbers = #tpu.dot_dimension_numbers<[1], [0], [0], [1], [0, 0, 1, 1], [], []>} : vector<2x8xf32>, vector<8x32xf32>, vector<2x32xf32> -> vector<2x32xf32>
    %c0_9 = arith.constant 0 : index
    %c0_10 = arith.constant 0 : index
    %10 = vector.load %arg4[%c0_9, %c0_10] : memref<1x32xf32, #tpu.memory_space<vmem>>, vector<1x32xf32>
    %11 = vector.broadcast %10 : vector<1x32xf32> to vector<2x32xf32>
    %12 = arith.addf %9, %11 : vector<2x32xf32>
    %cst_11 = arith.constant 3.000000e+00 : f32
    %13 = vector.broadcast %cst_11 : f32 to vector<2x32xf32>
    %14 = arith.addf %12, %13 : vector<2x32xf32>
    %cst_12 = arith.constant 6.000000e+00 : f32
    %15 = vector.broadcast %cst_12 : f32 to vector<2x32xf32>
    %16 = arith.divf %14, %15 : vector<2x32xf32>
    %cst_13 = arith.constant 0.000000e+00 : f32
    %cst_14 = arith.constant 1.000000e+00 : f32
    %17 = vector.broadcast %cst_13 : f32 to vector<2x32xf32>
    %18 = arith.maximumf %17, %16 : vector<2x32xf32>
    %19 = vector.broadcast %cst_14 : f32 to vector<2x32xf32>
    %20 = arith.minimumf %19, %18 : vector<2x32xf32>
    %c0_15 = arith.constant 0 : index
    %c0_16 = arith.constant 0 : index
    %21 = vector.load %arg5[%c0_15, %c0_16] : memref<2x32xf32, #tpu.memory_space<vmem>>, vector<2x32xf32>
    tpu.vector_store %arg5[%c0_15, %c0_16], %20 {strides = array<i32>} : memref<2x32xf32, #tpu.memory_space<vmem>>, vector<2x32xf32>,
    return
  }
}

module attributes {stable_mosaic.version = 11 : i64} {
  func.func @_scale_mul_kernel(%arg0: i32, %arg1: i32, %arg2: memref<64x256xf32, #tpu.memory_space<vmem>>, %arg3: memref<64x1xf32, #tpu.memory_space<vmem>>, %arg4: memref<64x256xf32, #tpu.memory_space<vmem>>) attributes {dimension_semantics = [#tpu.dimension_semantics<parallel>, #tpu.dimension_semantics<parallel>], iteration_bounds = array<i64: 1, 1>, scalar_prefetch = 0 : i64, scratch_operands = 0 : i64, tpu.core_type = #tpu.core_type<tc>, window_params = [{transform_indices = @transform_0, window_bounds = array<i64: 64, 256>}, {transform_indices = @transform_1, window_bounds = array<i64: 64, 1>}, {transform_indices = @transform_2, window_bounds = array<i64: 64, 256>}]} {
    %c0 = arith.constant 0 : index
    %c0_0 = arith.constant 0 : index
    %0 = vector.load %arg2[%c0, %c0_0] : memref<64x256xf32, #tpu.memory_space<vmem>>, vector<64x256xf32>
    %c0_1 = arith.constant 0 : index
    %c0_2 = arith.constant 0 : index
    %1 = vector.load %arg3[%c0_1, %c0_2] : memref<64x1xf32, #tpu.memory_space<vmem>>, vector<64x1xf32>
    %2 = vector.broadcast %1 : vector<64x1xf32> to vector<64x256xf32>
    %3 = arith.mulf %0, %2 : vector<64x256xf32>
    %c0_3 = arith.constant 0 : index
    %c0_4 = arith.constant 0 : index
    %4 = vector.load %arg4[%c0_3, %c0_4] : memref<64x256xf32, #tpu.memory_space<vmem>>, vector<64x256xf32>
    tpu.vector_store %arg4[%c0_3, %c0_4], %3 {strides = array<i32>} : memref<64x256xf32, #tpu.memory_space<vmem>>, vector<64x256xf32>,
    return
  }
  func.func @transform_0(%arg0: i32, %arg1: i32) -> (i32, i32) {
    %c0_i32 = arith.constant 0 : i32
    return %arg0, %arg1 : i32, i32
  }
  func.func @transform_1(%arg0: i32, %arg1: i32) -> (i32, i32) {
    %c0_i32 = arith.constant 0 : i32
    %c0_i32_0 = arith.constant 0 : i32
    return %arg0, %c0_i32 : i32, i32
  }
  func.func @transform_2(%arg0: i32, %arg1: i32) -> (i32, i32) {
    %c0_i32 = arith.constant 0 : i32
    return %arg0, %arg1 : i32, i32
  }
}

</mosaic_0001>

<bundles_post_ra>
// kernel: se_layer.3
= control target key start
LH: loop header
LB: loop body
LE: loop exit
PB: predicated region body
PF: predicated region fallthrough
CT: control target
= control target key end

     0   :  { %vm12_vm0 = vcmask 7168   ;;  %v118_v3 = vmov 0.0   ;;  %s321_s0 = inlined_call_operand.vmem [shape: f32[64,256], index: 0, kind: input, shape index: {}]   ;;  %s322_s1 = inlined_call_operand.vmem [shape: f32[64,1], index: 1, kind: output, shape index: {}]  }
   0x1   :  { %v33_v0 = vld [vmem:[%s321_s0 + $0x20] sm:$0xff]  ;;  %v34_v1 = vld [vmem:[%s321_s0 + $0x28] sm:$0xff]  ;;  %15 = vst.msk [vmem:[%s322_s1 + $0x10] sm:$0xff] %vm12_vm0, %v118_v3  ;;  %13 = vst.msk [vmem:[%s322_s1] sm:$0xff] %vm12_vm0, %v118_v3 }
   0x2   :  { %v29_v2 = vld [vmem:[%s321_s0] sm:$0xff]  ;;  %14 = vst.msk [vmem:[%s322_s1 + $0x8] sm:$0xff] %vm12_vm0, %v118_v3  ;;  %16 = vst.msk [vmem:[%s322_s1 + $0x18] sm:$0xff] %vm12_vm0, %v118_v3  ;;  %v51_v4 = vadd.f32 %v34_v1, %v33_v0  ;;  %v30_v5 = vld [vmem:[%s321_s0 + $0x8] sm:$0xff] }
   0x3   :  { %17 = vst.msk [vmem:[%s322_s1 + $0x20] sm:$0xff] %vm12_vm0, %v118_v3  ;;  %18 = vst.msk [vmem:[%s322_s1 + $0x28] sm:$0xff] %vm12_vm0, %v118_v3  ;;  %v35_v6 = vld [vmem:[%s321_s0 + $0x30] sm:$0xff]  ;;  %v36_v7 = vld [vmem:[%s321_s0 + $0x38] sm:$0xff]  ;;  %v45_v8 = vadd.f32 %v30_v5, %v29_v2 }
   0x4   :  { %19 = vst.msk [vmem:[%s322_s1 + $0x30] sm:$0xff] %vm12_vm0, %v118_v3  ;;  %20 = vst.msk [vmem:[%s322_s1 + $0x38] sm:$0xff] %vm12_vm0, %v118_v3  ;;  %v31_v9 = vld [vmem:[%s321_s0 + $0x10] sm:$0xff]  ;;  %v32_v10 = vld [vmem:[%s321_s0 + $0x18] sm:$0xff]  ;;  %52 = vadd.xlane.f32.xlu1 %v51_v4  ;;  %v54_v11 = vadd.f32 %v36_v7, %v35_v6 }
   0x5   :  { %46 = vadd.xlane.f32.xlu0 %v45_v8  ;;  %v48_v12 = vadd.f32 %v32_v10, %v31_v9  ;;  %v39_v13 = vld [vmem:[%s321_s0 + $0x50] sm:$0xff]  ;;  %v40_v14 = vld [vmem:[%s321_s0 + $0x58] sm:$0xff]  ;;  %v37_v15 = vld [vmem:[%s321_s0 + $0x40] sm:$0xff] }
   0x6   :  { %v38_v16 = vld [vmem:[%s321_s0 + $0x48] sm:$0xff]  ;;  %v60_v17 = vadd.f32 %v40_v14, %v39_v13  ;;  %v43_v19 = vld [vmem:[%s321_s0 + $0x70] sm:$0xff]  ;;  %v44_v20 = vld [vmem:[%s321_s0 + $0x78] sm:$0xff] }
   0x7   :  { %v57_v18 = vadd.f32 %v38_v16, %v37_v15  ;;  %v41_v21 = vld [vmem:[%s321_s0 + $0x60] sm:$0xff]  ;;  %v42_v22 = vld [vmem:[%s321_s0 + $0x68] sm:$0xff]  ;;  %v66_v23 = vadd.f32 %v44_v20, %v43_v19 }
   0x8   :  { %55 = vadd.xlane.f32.xlu1 %v54_v11  ;;  %v63_v24 = vadd.f32 %v42_v22, %v41_v21  ;;  %v23_v25 = vld [vmem:[%s322_s1 + $0x10] sm:$0xff]  ;;  %v21_v26 = vld [vmem:[%s322_s1] sm:$0xff] }
   0x9   :  { %49 = vadd.xlane.f32.xlu0 %v48_v12  ;;  %v24_v31 = vld [vmem:[%s322_s1 + $0x18] sm:$0xff]  ;;  %v22_v32 = vld [vmem:[%s322_s1 + $0x8] sm:$0xff] }
   0xa   :  { %v26_v37 = vld [vmem:[%s322_s1 + $0x28] sm:$0xff]  ;;  %v25_v38 = vld [vmem:[%s322_s1 + $0x20] sm:$0xff] }
   0xb   :  { %v28_v44 = vld [vmem:[%s322_s1 + $0x38] sm:$0xff]  ;;  %v27_v47 = vld [vmem:[%s322_s1 + $0x30] sm:$0xff] }
   0xc   :  { %61 = vadd.xlane.f32.xlu1 %v60_v17 }
   0xd   :  { %58 = vadd.xlane.f32.xlu0 %v57_v18 }
  0x10   :  { %67 = vadd.xlane.f32.xlu1 %v66_v23 }
  0x11   :  { %64 = vadd.xlane.f32.xlu0 %v63_v24 }
  0x91   :  { %v53_v27 = vpop.xlane.xlu1 %52 }
  0x92   :  { %v71_v28 = vadd.f32 %v53_v27, %v23_v25  ;;  %v47_v29 = vpop.xlane.xlu0 %46 }
  0x93   :  { %v69_v30 = vadd.f32 %v47_v29, %v21_v26 }
  0x94   :  { %80 = vst.msk [vmem:[%s322_s1 + $0x10] sm:$0xff] %vm12_vm0, %v71_v28 }
  0x95   :  { %78 = vst.msk [vmem:[%s322_s1] sm:$0xff] %vm12_vm0, %v69_v30  ;;  %v56_v33 = vpop.xlane.xlu1 %55 }
  0x96   :  { %v72_v34 = vadd.f32 %v56_v33, %v24_v31  ;;  %v50_v35 = vpop.xlane.xlu0 %49 }
  0x97   :  { %v70_v36 = vadd.f32 %v50_v35, %v22_v32 }
  0x98   :  { %81 = vst.msk [vmem:[%s322_s1 + $0x18] sm:$0xff] %vm12_vm0, %v72_v34 }
  0x99   :  { %79 = vst.msk [vmem:[%s322_s1 + $0x8] sm:$0xff] %vm12_vm0, %v70_v36  ;;  %v62_v39 = vpop.xlane.xlu1 %61 }
  0x9a   :  { %v74_v40 = vadd.f32 %v62_v39, %v26_v37  ;;  %v59_v41 = vpop.xlane.xlu0 %58 }
  0x9b   :  { %v91_v42 = vld [vmem:[%s322_s1 + $0x10] sm:$0xff]  ;;  %v73_v43 = vadd.f32 %v59_v41, %v25_v38 }
  0x9c   :  { %v99_v45 = vmul.f32 0.00390625, %v91_v42  ;;  %v89_v46 = vld [vmem:[%s322_s1] sm:$0xff]  ;;  %83 = vst.msk [vmem:[%s322_s1 + $0x28] sm:$0xff] %vm12_vm0, %v74_v40 }
  0x9d   :  { %v97_v48 = vmul.f32 0.00390625, %v89_v46  ;;  %82 = vst.msk [vmem:[%s322_s1 + $0x20] sm:$0xff] %vm12_vm0, %v73_v43  ;;  %v68_v49 = vpop.xlane.xlu1 %67 }
  0x9e   :  { %107 = vst.msk [vmem:[%s322_s1 + $0x10] sm:$0xff] %vm12_vm0, %v99_v45  ;;  %v76_v50 = vadd.f32 %v68_v49, %v28_v44  ;;  %v65_v51 = vpop.xlane.xlu0 %64 }
  0x9f   :  { %105 = vst.msk [vmem:[%s322_s1] sm:$0xff] %vm12_vm0, %v97_v48  ;;  %v92_v52 = vld [vmem:[%s322_s1 + $0x18] sm:$0xff]  ;;  %v75_v53 = vadd.f32 %v65_v51, %v27_v47 }
  0xa0   :  { %v100_v54 = vmul.f32 0.00390625, %v92_v52  ;;  %v90_v55 = vld [vmem:[%s322_s1 + $0x8] sm:$0xff]  ;;  %85 = vst.msk [vmem:[%s322_s1 + $0x38] sm:$0xff] %vm12_vm0, %v76_v50 }
  0xa1   :  { %v98_v56 = vmul.f32 0.00390625, %v90_v55  ;;  %84 = vst.msk [vmem:[%s322_s1 + $0x30] sm:$0xff] %vm12_vm0, %v75_v53 }
  0xa2   :  { %108 = vst.msk [vmem:[%s322_s1 + $0x18] sm:$0xff] %vm12_vm0, %v100_v54 }
  0xa3   :  { %106 = vst.msk [vmem:[%s322_s1 + $0x8] sm:$0xff] %vm12_vm0, %v98_v56  ;;  %v94_v57 = vld [vmem:[%s322_s1 + $0x28] sm:$0xff] }
  0xa4   :  { %v102_v58 = vmul.f32 0.00390625, %v94_v57  ;;  %v93_v59 = vld [vmem:[%s322_s1 + $0x20] sm:$0xff] }
  0xa5   :  { %v101_v60 = vmul.f32 0.00390625, %v93_v59 }
  0xa6   :  { %110 = vst.msk [vmem:[%s322_s1 + $0x28] sm:$0xff] %vm12_vm0, %v102_v58 }
  0xa7   :  { %109 = vst.msk [vmem:[%s322_s1 + $0x20] sm:$0xff] %vm12_vm0, %v101_v60  ;;  %v96_v61 = vld [vmem:[%s322_s1 + $0x38] sm:$0xff] }
  0xa8   :  { %v104_v62 = vmul.f32 0.00390625, %v96_v61  ;;  %v95_v63 = vld [vmem:[%s322_s1 + $0x30] sm:$0xff] }
  0xa9   :  { %v103_v0 = vmul.f32 0.00390625, %v95_v63 }
  0xaa   :  { %112 = vst.msk [vmem:[%s322_s1 + $0x38] sm:$0xff] %vm12_vm0, %v104_v62 }
  0xab   :  { %111 = vst.msk [vmem:[%s322_s1 + $0x30] sm:$0xff] %vm12_vm0, %v103_v0 }

// kernel: se_layer.4
= control target key start
LH: loop header
LB: loop body
LE: loop exit
PB: predicated region body
PF: predicated region fallthrough
CT: control target
= control target key end

     0   :  { %v236_v0 = vmov 0.0|0.0   ;;  %vm237_vm0 = vmmov 0   ;;  %v238_v4 = vmov 0.0   ;;  %vm32_vm1 = vcmask 261120   ;;  %s296_s1 = inlined_call_operand.vmem [shape: f32[32,8], index: 1, kind: input, shape index: {}]   ;;  %s297_s0 = inlined_call_operand.vmem [shape: f32[2,32], index: 0, kind: input, shape index: {}]   ;;  %s298_s3 = inlined_call_operand.vmem [shape: f32[8,32], index: 3, kind: input, shape index: {}]   ;;  %s299_s2 = inlined_call_operand.vmem [shape: f32[1,8], index: 2, kind: input, shape index: {}]   ;;  %s300_s4 = inlined_call_operand.vmem [shape: f32[1,32], index: 4, kind: input, shape index: {}]   ;;  %s301_s5 = inlined_call_operand.vmem [shape: f32[2,32], index: 5, kind: output, shape index: {}]  }
   0x1   :  { %227 = vmatprep.subr.bf16.mxu0 %v236_v0  ;;  %v21_v1 = vld [vmem:[%s296_s1] sm:$0xff]  ;;  %v22_v2 = vld [vmem:[%s296_s1 + $0x8] sm:$0xff]  ;;  %v23_v3 = vld [vmem:[%s296_s1 + $0x10] sm:$0xff]  ;;  %219 = vmatprep.mubr.msk.f32.mxu0 %vm237_vm0, %v238_v4  ;;  %vm115_vm2 = vcmask 64512   ;;  %vm194_vm3 = vcmask 254976  }
   0x2   :  { %v228_v5 = vpack.c.bf16 %v22_v2, %v21_v1  ;;  %v24_v6 = vld [vmem:[%s296_s1 + $0x18] sm:$0xff]  ;;  %222 = vmatprep.subr.mxu1 %v238_v4  ;;  %224 = vmatprep.mubr.msk.f32.mxu1 %vm237_vm0, %v238_v4  ;;  %v20_v8 = vld [vmem:[%s297_s0] sm:$0x3] }
   0x3   :  { %v231_v7 = vpack.c.bf16 %v24_v6, %v23_v3  ;;  %v107_v9 = vld [vmem:[%s298_s3] sm:$0xff] }
   0x4   :  { %229 = vmatpush3.bf16.msra.mxu0 %v228_v5  ;;  %223 = vmatpush3.msra.mxu1 %v107_v9  ;;  %v200_v10 = vld [vmem:[%s299_s2] ss:$0 sm:$0xff] }
   0x5   :  { %230 = vmatprep.subr.bf16.mxu0 %v236_v0  ;;  %v202_v15 = vld [vmem:[%s300_s4] ss:$0 sm:$0xff] }
   0x8   :  { %232 = vmatpush3.bf16.msra.mxu0 %v231_v7 }
   0xb   :  { %220 = vmatmul.mubr.msk.f32.vlgmr.msra.gmra.mrb[0].mxu0 %vm32_vm1, %v20_v8 }
  0xde   :  { %v102_v11 = vpop.f32.mrb[0].mxu0 }
  0xdf   :  { %v103_v12 = vadd.f32 %v200_v10, %v102_v11  ;;  %v221_v13 = vpop.f32.mrb[1].mxu0 }
  0xe1   :  { %v106_v14 = vmax.f32 %v103_v12, 0.0 }
  0xe3   :  { %225 = vmatmul.mubr.msk.f32.vlgmr.msra.gmra.mrb[0].mxu1 %vm115_vm2, %v106_v14 }
 0x1b6   :  { %v185_v16 = vpop.f32.mrb[0].mxu1 }
 0x1b7   :  { %v186_v17 = vadd.f32 %v202_v15, %v185_v16  ;;  %v226_v18 = vpop.f32.mrb[1].mxu1 }
 0x1b9   :  { %v189_v19 = vadd.f32 3.0, %v186_v17 }
 0x1bb   :  { %v191_v20 = vmul.f32 0.16666667, %v189_v19 }
 0x1bd   :  { %v192_v21 = vmax.f32 %v191_v20, 0.0 }
 0x1bf   :  { %v193_v22 = vmin.f32 %v192_v21, 1.0 }
 0x1c1   :  { %195 = vst.msk [vmem:[%s301_s5] sm:$0x3] %vm194_vm3, %v193_v22 }

// kernel: se_layer.5
= control target key start
LH: loop header
LB: loop body
LE: loop exit
PB: predicated region body
PF: predicated region fallthrough
CT: control target
= control target key end

     0   :  { %v114_v0 = vmov 0   ;;  %s250_s1 = inlined_call_operand.vmem [shape: f32[64,1], index: 1, kind: input, shape index: {}]   ;;  %s251_s0 = inlined_call_operand.vmem [shape: f32[64,256], index: 0, kind: input, shape index: {}]   ;;  %s252_s2 = inlined_call_operand.vmem [shape: f32[64,256], index: 2, kind: output, shape index: {}]  }
   0x1   :  { %113 = vset.pattern.permute.xlu1 %v114_v0  ;;  %112 = vset.pattern.permute.xlu0 %v114_v0  ;;  %v29_v1 = vld [vmem:[%s250_s1 + $0x10] sm:$0xff]  ;;  %v27_v2 = vld [vmem:[%s250_s1] sm:$0xff]  ;;  %v30_v3 = vld [vmem:[%s250_s1 + $0x18] sm:$0xff] }
   0x2   :  { %47 = vperm.xlu1 %113, %v29_v1   ;;  %37 = vperm.xlu0 %112, %v27_v2   ;;  %v28_v4 = vld [vmem:[%s250_s1 + $0x8] sm:$0xff]  ;;  %v31_v6 = vld [vmem:[%s250_s1 + $0x20] sm:$0xff]  ;;  %v34_v7 = vld [vmem:[%s250_s1 + $0x38] sm:$0xff] }
   0x3   :  { %v32_v5 = vld [vmem:[%s250_s1 + $0x28] sm:$0xff]  ;;  %v33_v8 = vld [vmem:[%s250_s1 + $0x30] sm:$0xff]  ;;  %v15_v9 = vld [vmem:[%s251_s0 + $0x20] sm:$0xff] }
   0x4   :  { %v16_v10 = vld [vmem:[%s251_s0 + $0x28] sm:$0xff]  ;;  %v11_v11 = vld [vmem:[%s251_s0] sm:$0xff]  ;;  %v17_v19 = vld [vmem:[%s251_s0 + $0x30] sm:$0xff] }
   0x5   :  { %v12_v12 = vld [vmem:[%s251_s0 + $0x8] sm:$0xff]  ;;  %v18_v20 = vld [vmem:[%s251_s0 + $0x38] sm:$0xff]  ;;  %v13_v21 = vld [vmem:[%s251_s0 + $0x10] sm:$0xff] }
   0x6   :  { %52 = vperm.xlu1 %113, %v30_v3   ;;  %42 = vperm.xlu0 %112, %v28_v4   ;;  %v14_v22 = vld [vmem:[%s251_s0 + $0x18] sm:$0xff]  ;;  %v21_v29 = vld [vmem:[%s251_s0 + $0x50] sm:$0xff]  ;;  %v19_v31 = vld [vmem:[%s251_s0 + $0x40] sm:$0xff] }
   0x7   :  { %v22_v30 = vld [vmem:[%s251_s0 + $0x58] sm:$0xff]  ;;  %v20_v32 = vld [vmem:[%s251_s0 + $0x48] sm:$0xff]  ;;  %v25_v39 = vld [vmem:[%s251_s0 + $0x70] sm:$0xff] }
   0x8   :  { %v26_v40 = vld [vmem:[%s251_s0 + $0x78] sm:$0xff]  ;;  %v23_v41 = vld [vmem:[%s251_s0 + $0x60] sm:$0xff]  ;;  %v24_v42 = vld [vmem:[%s251_s0 + $0x68] sm:$0xff] }
   0xa   :  { %62 = vperm.xlu1 %113, %v32_v5   ;;  %57 = vperm.xlu0 %112, %v31_v6  }
   0xe   :  { %72 = vperm.xlu1 %113, %v34_v7   ;;  %67 = vperm.xlu0 %112, %v33_v8  }
  0x81   :  { %v48_v13 = vpop.permute.xlu1 %47  ;;  %v38_v14 = vpop.permute.xlu0 %37 }
  0x82   :  { %v79_v15 = vmul.f32 %v48_v13, %v15_v9  ;;  %v80_v16 = vmul.f32 %v48_v13, %v16_v10  ;;  %v75_v17 = vmul.f32 %v38_v14, %v11_v11  ;;  %v76_v18 = vmul.f32 %v38_v14, %v12_v12 }
  0x84   :  { %95 = vst [vmem:[%s252_s2 + $0x20] sm:$0xff] %v79_v15  ;;  %96 = vst [vmem:[%s252_s2 + $0x28] sm:$0xff] %v80_v16 }
  0x85   :  { %91 = vst [vmem:[%s252_s2] sm:$0xff] %v75_v17  ;;  %92 = vst [vmem:[%s252_s2 + $0x8] sm:$0xff] %v76_v18  ;;  %v53_v23 = vpop.permute.xlu1 %52  ;;  %v43_v24 = vpop.permute.xlu0 %42 }
  0x86   :  { %v81_v25 = vmul.f32 %v53_v23, %v17_v19  ;;  %v82_v26 = vmul.f32 %v53_v23, %v18_v20  ;;  %v77_v27 = vmul.f32 %v43_v24, %v13_v21  ;;  %v78_v28 = vmul.f32 %v43_v24, %v14_v22 }
  0x88   :  { %97 = vst [vmem:[%s252_s2 + $0x30] sm:$0xff] %v81_v25  ;;  %98 = vst [vmem:[%s252_s2 + $0x38] sm:$0xff] %v82_v26 }
  0x89   :  { %93 = vst [vmem:[%s252_s2 + $0x10] sm:$0xff] %v77_v27  ;;  %94 = vst [vmem:[%s252_s2 + $0x18] sm:$0xff] %v78_v28  ;;  %v63_v33 = vpop.permute.xlu1 %62  ;;  %v58_v34 = vpop.permute.xlu0 %57 }
  0x8a   :  { %v85_v35 = vmul.f32 %v63_v33, %v21_v29  ;;  %v86_v36 = vmul.f32 %v63_v33, %v22_v30  ;;  %v83_v37 = vmul.f32 %v58_v34, %v19_v31  ;;  %v84_v38 = vmul.f32 %v58_v34, %v20_v32 }
  0x8c   :  { %101 = vst [vmem:[%s252_s2 + $0x50] sm:$0xff] %v85_v35  ;;  %102 = vst [vmem:[%s252_s2 + $0x58] sm:$0xff] %v86_v36 }
  0x8d   :  { %99 = vst [vmem:[%s252_s2 + $0x40] sm:$0xff] %v83_v37  ;;  %100 = vst [vmem:[%s252_s2 + $0x48] sm:$0xff] %v84_v38  ;;  %v73_v43 = vpop.permute.xlu1 %72  ;;  %v68_v44 = vpop.permute.xlu0 %67 }
  0x8e   :  { %v89_v45 = vmul.f32 %v73_v43, %v25_v39  ;;  %v90_v46 = vmul.f32 %v73_v43, %v26_v40  ;;  %v87_v47 = vmul.f32 %v68_v44, %v23_v41  ;;  %v88_v48 = vmul.f32 %v68_v44, %v24_v42 }
  0x90   :  { %105 = vst [vmem:[%s252_s2 + $0x70] sm:$0xff] %v89_v45  ;;  %106 = vst [vmem:[%s252_s2 + $0x78] sm:$0xff] %v90_v46 }
  0x91   :  { %103 = vst [vmem:[%s252_s2 + $0x60] sm:$0xff] %v87_v47  ;;  %104 = vst [vmem:[%s252_s2 + $0x68] sm:$0xff] %v88_v48 }

</bundles_post_ra>
